<compile_context>
chip_gen: v6e
topology: v6e:2x2x1
jax: 0.10.0
libtpu: 0.0.40
codegen_flags: <defaults>
</compile_context>

<pallas_src>
import functools

import jax
import jax.numpy as jnp
from jax.experimental import pallas as pl
from jax.experimental.pallas import tpu as pltpu


def mha_kernel(x_ref, wqkv_ref, wproj_ref, bproj_ref, o_ref, *, num_heads, head_size):
    """One grid step = block_b batch elements. All heads + output projection."""
    Bb, T, C = x_ref.shape
    H, hs = num_heads, head_size
    HH = H * hs
    scale = hs ** (-0.5)

    # Causal mask (tril), computed once per grid step and shared by all heads.
    row = jax.lax.broadcasted_iota(jnp.int32, (T, T), 0)
    col = jax.lax.broadcasted_iota(jnp.int32, (T, T), 1)
    causal = col <= row                                     # (T, T) bool

    # --- Packed QKV projection: one MXU matmul with N = 3*H*hs output lanes. ---
    x2 = x_ref[...].reshape(Bb * T, C).astype(jnp.bfloat16)
    wqkv = wqkv_ref[...].astype(jnp.bfloat16)               # (C, 3*HH)
    qkv = jnp.dot(x2, wqkv, preferred_element_type=jnp.float32)   # (Bb*T, 3*HH) f32
    qkv = qkv.reshape(Bb, T, 3 * HH)

    # Scale q on the (Bb, T, HH) tensor instead of the (T, T) scores (T/hs fewer muls).
    q_all = qkv[:, :, 0 * HH:1 * HH] * scale
    k_all = qkv[:, :, 1 * HH:2 * HH]
    v_all = qkv[:, :, 2 * HH:3 * HH]

    wproj = wproj_ref[...].astype(jnp.bfloat16)             # (HH, C)

    # Fold each head's output straight into one (Bb*T, C) f32 accumulator:
    # no concatenate, no lane re-layout, small live set.
    acc = jnp.zeros((Bb * T, C), jnp.float32)
    for h in range(H):                                      # unrolled at trace time
        lo, hi = h * hs, (h + 1) * hs
        q = q_all[:, :, lo:hi]                              # (Bb, T, hs) f32
        k = k_all[:, :, lo:hi]
        v = v_all[:, :, lo:hi]

        s = jnp.einsum('btd,bsd->bts', q, k,
                       preferred_element_type=jnp.float32)  # (Bb, T, T)
        s = jnp.where(causal, s, -jnp.inf)

        # Numerically-stable softmax, kept in f32.
        m = jnp.max(s, axis=-1, keepdims=True)
        e = jnp.exp(s - m)
        denom = jnp.sum(e, axis=-1, keepdims=True)
        p = e * pl.reciprocal(denom, approx=True)
        # TODO(synk): attention dropout omitted (eval-mode identity).

        oh = jnp.einsum('bts,bsd->btd', p, v,
                        preferred_element_type=jnp.float32)  # (Bb, T, hs)
        acc = acc + jnp.dot(oh.reshape(Bb * T, hs).astype(jnp.bfloat16),
                            wproj[lo:hi, :],
                            preferred_element_type=jnp.float32)

    out = acc + bproj_ref[...]                              # (Bb*T, C) + (1, C)
    # TODO(synk): output dropout omitted (eval-mode identity).
    o_ref[...] = out.reshape(Bb, T, C).astype(o_ref.dtype)


def multi_head_attention(x, wq, wk, wv, wproj, bproj, *, num_heads, head_size,
                         block_b=None):
    B, T, C = x.shape
    HH = num_heads * head_size
    assert wq.shape == (C, HH) and wk.shape == (C, HH) and wv.shape == (C, HH)
    assert wproj.shape == (HH, C) and bproj.shape == (C,)

    if block_b is None:
        divisors = [c for c in (8, 4, 2, 1) if B % c == 0]
        # Prefer >= 2 grid steps (both TensorCores busy on megacore parts), then the
        # largest block dividing B (amortizes ~0.35us per-grid-step overhead).
        block_b = next((c for c in divisors if B // c >= 2), divisors[0])
    assert B % block_b == 0

    wqkv = jnp.concatenate([wq, wk, wv], axis=1)            # (C, 3*HH), packed once
    bproj2 = bproj.reshape(1, C)                            # 2-D lane-major tile

    kernel = functools.partial(mha_kernel, num_heads=num_heads, head_size=head_size)
    return pl.pallas_call(
        kernel,
        out_shape=jax.ShapeDtypeStruct((B, T, C), x.dtype),
        grid_spec=pltpu.PrefetchScalarGridSpec(
            num_scalar_prefetch=0,
            grid=(B // block_b,),
            in_specs=[
                pl.BlockSpec((block_b, T, C), lambda b: (b, 0, 0)),  # x
                pl.BlockSpec((C, 3 * HH), lambda b: (0, 0)),         # packed [wq|wk|wv]
                pl.BlockSpec((HH, C), lambda b: (0, 0)),             # wproj
                pl.BlockSpec((1, C), lambda b: (0, 0)),              # bproj (2-D)
            ],
            out_specs=pl.BlockSpec((block_b, T, C), lambda b: (b, 0, 0)),
        ),
        compiler_params=pltpu.CompilerParams(
            dimension_semantics=("parallel",)),
    )(x, wqkv, wproj, bproj2)


def reference_mha(x, wq, wk, wv, wproj, bproj, *, num_heads, head_size):
    """Pure-JAX f32 reference mirroring the PyTorch forward (eval mode)."""
    B, T, C = x.shape
    mask = jnp.tril(jnp.ones((T, T), dtype=bool))
    outs = []
    for h in range(num_heads):
        lo, hi = h * head_size, (h + 1) * head_size
        q = x @ wq[:, lo:hi]
        k = x @ wk[:, lo:hi]
        v = x @ wv[:, lo:hi]
        att = (q @ jnp.swapaxes(k, -2, -1)) * head_size ** (-0.5)
        att = jnp.where(mask, att, -jnp.inf)
        att = jax.nn.softmax(att, axis=-1)
        outs.append(att @ v)
    concat = jnp.concatenate(outs, axis=-1)
    return concat @ wproj + bproj


if __name__ == "__main__":
    # Small, module-consistent shapes.
    B = 4            # batch (block_b=2 -> grid of 2 parallel steps)
    T = 8            # sequence length (== block_size)
    num_heads = 4
    head_size = 8
    C = num_heads * head_size   # embedding_size = 32

    key = jax.random.PRNGKey(0)
    kx, kq, kk, kv, kp, kb = jax.random.split(key, 6)

    x = jax.random.normal(kx, (B, T, C), dtype=jnp.float32)

    # Deterministic parameter init. nn.Linear weight is (out, in); we store the
    # transposed (in, out) form that the kernel consumes directly.
    scale_qkv = (1.0 / C) ** 0.5
    wq = (jax.random.uniform(kq, (C, num_heads * head_size), jnp.float32,
                             minval=-1.0, maxval=1.0) * scale_qkv)
    wk = (jax.random.uniform(kk, (C, num_heads * head_size), jnp.float32,
                             minval=-1.0, maxval=1.0) * scale_qkv)
    wv = (jax.random.uniform(kv, (C, num_heads * head_size), jnp.float32,
                             minval=-1.0, maxval=1.0) * scale_qkv)
    scale_proj = (1.0 / (num_heads * head_size)) ** 0.5
    wproj = (jax.random.uniform(kp, (num_heads * head_size, C), jnp.float32,
                                minval=-1.0, maxval=1.0) * scale_proj)
    bproj = (jax.random.uniform(kb, (C,), jnp.float32,
                                minval=-1.0, maxval=1.0) * scale_proj)

    out = multi_head_attention(x, wq, wk, wv, wproj, bproj,
                               num_heads=num_heads, head_size=head_size)
    out = jax.block_until_ready(out)

    ref = reference_mha(x, wq, wk, wv, wproj, bproj,
                        num_heads=num_heads, head_size=head_size)
    assert out.shape == (B, T, C)
    # Tolerance accounts for bf16 mixed-precision matmul operands (f32 accumulate)
    # and the approx EUP reciprocal in the softmax normalization.
    err = float(jnp.max(jnp.abs(out - ref)))
    assert jnp.allclose(out, ref, atol=2e-2, rtol=2e-2), f"mismatch vs reference, max|diff|={err}"

    print("KERNEL_OK")
</pallas_src>

<mosaic_0001>
module attributes {stable_mosaic.version = 11 : i64} {
  func.func @mha_kernel(%arg0: i32, %arg1: memref<2x8x32xf32, #tpu.memory_space<vmem>>, %arg2: memref<32x96xf32, #tpu.memory_space<vmem>>, %arg3: memref<32x32xf32, #tpu.memory_space<vmem>>, %arg4: memref<1x32xf32, #tpu.memory_space<vmem>>, %arg5: memref<2x8x32xf32, #tpu.memory_space<vmem>>) attributes {dimension_semantics = [#tpu.dimension_semantics<parallel>], iteration_bounds = array<i64: 2>, scalar_prefetch = 0 : i64, scratch_operands = 0 : i64, tpu.core_type = #tpu.core_type<tc>, window_params = [{transform_indices = @transform_0, window_bounds = array<i64: 2, 8, 32>}, {pipeline_mode = #tpu.pipeline_mode<synchronous>, transform_indices = @transform_1, window_bounds = array<i64: 32, 96>}, {pipeline_mode = #tpu.pipeline_mode<synchronous>, transform_indices = @transform_2, window_bounds = array<i64: 32, 32>}, {pipeline_mode = #tpu.pipeline_mode<synchronous>, transform_indices = @transform_3, window_bounds = array<i64: 1, 32>}, {transform_indices = @transform_4, window_bounds = array<i64: 2, 8, 32>}]} {
    %0 = tpu.iota {dimensions = array<i32: 0>} : vector<8x8xi32>
    %1 = tpu.iota {dimensions = array<i32: 1>} : vector<8x8xi32>
    %2 = arith.cmpi sle, %1, %0 : vector<8x8xi32>
    %c0 = arith.constant 0 : index
    %c0_0 = arith.constant 0 : index
    %c0_1 = arith.constant 0 : index
    %3 = vector.load %arg1[%c0, %c0_0, %c0_1] : memref<2x8x32xf32, #tpu.memory_space<vmem>>, vector<2x8x32xf32>
    %4 = vector.shape_cast %3 : vector<2x8x32xf32> to vector<16x32xf32>
    %5 = arith.truncf %4 : vector<16x32xf32> to vector<16x32xbf16>
    %c0_2 = arith.constant 0 : index
    %c0_3 = arith.constant 0 : index
    %6 = vector.load %arg2[%c0_2, %c0_3] : memref<32x96xf32, #tpu.memory_space<vmem>>, vector<32x96xf32>
    %7 = arith.truncf %6 : vector<32x96xf32> to vector<32x96xbf16>
    %cst = arith.constant dense<0.000000e+00> : vector<16x96xf32>
    %8 = tpu.matmul %5, %7, %cst {dimension_numbers = #tpu.dot_dimension_numbers<[1], [0], [0], [1], [0, 0, 1, 1], [], []>} : vector<16x32xbf16>, vector<32x96xbf16>, vector<16x96xf32> -> vector<16x96xf32>
    %9 = vector.shape_cast %8 : vector<16x96xf32> to vector<2x8x96xf32>
    %10 = vector.extract_strided_slice %9 {offsets = [0, 0, 0], sizes = [2, 8, 32], strides = [1, 1, 1]} : vector<2x8x96xf32> to vector<2x8x32xf32>
    %cst_4 = arith.constant 0.353553385 : f32
    %11 = vector.broadcast %cst_4 : f32 to vector<2x8x32xf32>
    %12 = arith.mulf %10, %11 : vector<2x8x32xf32>
    %13 = vector.extract_strided_slice %9 {offsets = [0, 0, 32], sizes = [2, 8, 32], strides = [1, 1, 1]} : vector<2x8x96xf32> to vector<2x8x32xf32>
    %14 = vector.extract_strided_slice %9 {offsets = [0, 0, 64], sizes = [2, 8, 32], strides = [1, 1, 1]} : vector<2x8x96xf32> to vector<2x8x32xf32>
    %c0_5 = arith.constant 0 : index
    %c0_6 = arith.constant 0 : index
    %15 = vector.load %arg3[%c0_5, %c0_6] : memref<32x32xf32, #tpu.memory_space<vmem>>, vector<32x32xf32>
    %16 = arith.truncf %15 : vector<32x32xf32> to vector<32x32xbf16>
    %cst_7 = arith.constant 0.000000e+00 : f32
    %17 = vector.broadcast %cst_7 : f32 to vector<16x32xf32>
    %18 = vector.extract_strided_slice %12 {offsets = [0, 0, 0], sizes = [2, 8, 8], strides = [1, 1, 1]} : vector<2x8x32xf32> to vector<2x8x8xf32>
    %19 = vector.extract_strided_slice %13 {offsets = [0, 0, 0], sizes = [2, 8, 8], strides = [1, 1, 1]} : vector<2x8x32xf32> to vector<2x8x8xf32>
    %20 = vector.extract_strided_slice %14 {offsets = [0, 0, 0], sizes = [2, 8, 8], strides = [1, 1, 1]} : vector<2x8x32xf32> to vector<2x8x8xf32>
    "tpu.trace_start"() <{level = 10 : i32, message = "btd,bsd->bts"}> : () -> ()
    %cst_8 = arith.constant dense<0.000000e+00> : vector<2x8x8xf32>
    %21 = tpu.matmul %18, %19, %cst_8 {dimension_numbers = #tpu.dot_dimension_numbers<[2], [2], [1], [1], [0, 0, 0, 1, 1, 1], [0], [0]>} : vector<2x8x8xf32>, vector<2x8x8xf32>, vector<2x8x8xf32> -> vector<2x8x8xf32>
    %cst_9 = arith.constant 0xFF800000 : f32
    "tpu.trace_stop"() : () -> ()
    %22 = vector.shape_cast %2 : vector<8x8xi1> to vector<1x8x8xi1>
    %23 = vector.broadcast %22 : vector<1x8x8xi1> to vector<2x8x8xi1>
    %24 = vector.broadcast %cst_9 : f32 to vector<2x8x8xf32>
    %25 = arith.select %23, %21, %24 : vector<2x8x8xi1>, vector<2x8x8xf32>
    %cst_10 = arith.constant dense<0xFF800000> : vector<2x8xf32>
    %26 = vector.multi_reduction <maximumf>, %25, %cst_10 [2] : vector<2x8x8xf32> to vector<2x8xf32>
    %27 = vector.shape_cast %26 : vector<2x8xf32> to vector<2x8x1xf32>
    %28 = vector.broadcast %27 : vector<2x8x1xf32> to vector<2x8x8xf32>
    %29 = arith.subf %25, %28 : vector<2x8x8xf32>
    %30 = math.exp %29 : vector<2x8x8xf32>
    %cst_11 = arith.constant dense<0.000000e+00> : vector<2x8xf32>
    %31 = vector.multi_reduction <add>, %30, %cst_11 [2] : vector<2x8x8xf32> to vector<2x8xf32>
    %32 = vector.shape_cast %31 : vector<2x8xf32> to vector<2x8x1xf32>
    %33 = tpu.reciprocal %32 {approx = true} : vector<2x8x1xf32> -> vector<2x8x1xf32>
    %34 = vector.broadcast %33 : vector<2x8x1xf32> to vector<2x8x8xf32>
    %35 = arith.mulf %30, %34 : vector<2x8x8xf32>
    "tpu.trace_start"() <{level = 10 : i32, message = "bts,bsd->btd"}> : () -> ()
    %cst_12 = arith.constant dense<0.000000e+00> : vector<2x8x8xf32>
    %36 = tpu.matmul %35, %20, %cst_12 {dimension_numbers = #tpu.dot_dimension_numbers<[2], [1], [1], [2], [0, 0, 0, 1, 1, 2], [0], [0]>} : vector<2x8x8xf32>, vector<2x8x8xf32>, vector<2x8x8xf32> -> vector<2x8x8xf32>
    "tpu.trace_stop"() : () -> ()
    %37 = vector.shape_cast %36 : vector<2x8x8xf32> to vector<16x8xf32>
    %38 = arith.truncf %37 : vector<16x8xf32> to vector<16x8xbf16>
    %39 = vector.extract_strided_slice %16 {offsets = [0, 0], sizes = [8, 32], strides = [1, 1]} : vector<32x32xbf16> to vector<8x32xbf16>
    %cst_13 = arith.constant dense<0.000000e+00> : vector<16x32xf32>
    %40 = tpu.matmul %38, %39, %cst_13 {dimension_numbers = #tpu.dot_dimension_numbers<[1], [0], [0], [1], [0, 0, 1, 1], [], []>} : vector<16x8xbf16>, vector<8x32xbf16>, vector<16x32xf32> -> vector<16x32xf32>
    %41 = arith.addf %17, %40 : vector<16x32xf32>
    %42 = vector.extract_strided_slice %12 {offsets = [0, 0, 8], sizes = [2, 8, 8], strides = [1, 1, 1]} : vector<2x8x32xf32> to vector<2x8x8xf32>
    %43 = vector.extract_strided_slice %13 {offsets = [0, 0, 8], sizes = [2, 8, 8], strides = [1, 1, 1]} : vector<2x8x32xf32> to vector<2x8x8xf32>
    %44 = vector.extract_strided_slice %14 {offsets = [0, 0, 8], sizes = [2, 8, 8], strides = [1, 1, 1]} : vector<2x8x32xf32> to vector<2x8x8xf32>
    "tpu.trace_start"() <{level = 10 : i32, message = "btd,bsd->bts"}> : () -> ()
    %cst_14 = arith.constant dense<0.000000e+00> : vector<2x8x8xf32>
    %45 = tpu.matmul %42, %43, %cst_14 {dimension_numbers = #tpu.dot_dimension_numbers<[2], [2], [1], [1], [0, 0, 0, 1, 1, 1], [0], [0]>} : vector<2x8x8xf32>, vector<2x8x8xf32>, vector<2x8x8xf32> -> vector<2x8x8xf32>
    %cst_15 = arith.constant 0xFF800000 : f32
    "tpu.trace_stop"() : () -> ()
    %46 = vector.shape_cast %2 : vector<8x8xi1> to vector<1x8x8xi1>
    %47 = vector.broadcast %46 : vector<1x8x8xi1> to vector<2x8x8xi1>
    %48 = vector.broadcast %cst_15 : f32 to vector<2x8x8xf32>
    %49 = arith.select %47, %45, %48 : vector<2x8x8xi1>, vector<2x8x8xf32>
    %cst_16 = arith.constant dense<0xFF800000> : vector<2x8xf32>
    %50 = vector.multi_reduction <maximumf>, %49, %cst_16 [2] : vector<2x8x8xf32> to vector<2x8xf32>
    %51 = vector.shape_cast %50 : vector<2x8xf32> to vector<2x8x1xf32>
    %52 = vector.broadcast %51 : vector<2x8x1xf32> to vector<2x8x8xf32>
    %53 = arith.subf %49, %52 : vector<2x8x8xf32>
    %54 = math.exp %53 : vector<2x8x8xf32>
    %cst_17 = arith.constant dense<0.000000e+00> : vector<2x8xf32>
    %55 = vector.multi_reduction <add>, %54, %cst_17 [2] : vector<2x8x8xf32> to vector<2x8xf32>
    %56 = vector.shape_cast %55 : vector<2x8xf32> to vector<2x8x1xf32>
    %57 = tpu.reciprocal %56 {approx = true} : vector<2x8x1xf32> -> vector<2x8x1xf32>
    %58 = vector.broadcast %57 : vector<2x8x1xf32> to vector<2x8x8xf32>
    %59 = arith.mulf %54, %58 : vector<2x8x8xf32>
    "tpu.trace_start"() <{level = 10 : i32, message = "bts,bsd->btd"}> : () -> ()
    %cst_18 = arith.constant dense<0.000000e+00> : vector<2x8x8xf32>
    %60 = tpu.matmul %59, %44, %cst_18 {dimension_numbers = #tpu.dot_dimension_numbers<[2], [1], [1], [2], [0, 0, 0, 1, 1, 2], [0], [0]>} : vector<2x8x8xf32>, vector<2x8x8xf32>, vector<2x8x8xf32> -> vector<2x8x8xf32>
    "tpu.trace_stop"() : () -> ()
    %61 = vector.shape_cast %60 : vector<2x8x8xf32> to vector<16x8xf32>
    %62 = arith.truncf %61 : vector<16x8xf32> to vector<16x8xbf16>
    %63 = vector.extract_strided_slice %16 {offsets = [8, 0], sizes = [8, 32], strides = [1, 1]} : vector<32x32xbf16> to vector<8x32xbf16>
    %cst_19 = arith.constant dense<0.000000e+00> : vector<16x32xf32>
    %64 = tpu.matmul %62, %63, %cst_19 {dimension_numbers = #tpu.dot_dimension_numbers<[1], [0], [0], [1], [0, 0, 1, 1], [], []>} : vector<16x8xbf16>, vector<8x32xbf16>, vector<16x32xf32> -> vector<16x32xf32>
    %65 = arith.addf %41, %64 : vector<16x32xf32>
    %66 = vector.extract_strided_slice %12 {offsets = [0, 0, 16], sizes = [2, 8, 8], strides = [1, 1, 1]} : vector<2x8x32xf32> to vector<2x8x8xf32>
    %67 = vector.extract_strided_slice %13 {offsets = [0, 0, 16], sizes = [2, 8, 8], strides = [1, 1, 1]} : vector<2x8x32xf32> to vector<2x8x8xf32>
    %68 = vector.extract_strided_slice %14 {offsets = [0, 0, 16], sizes = [2, 8, 8], strides = [1, 1, 1]} : vector<2x8x32xf32> to vector<2x8x8xf32>
    "tpu.trace_start"() <{level = 10 : i32, message = "btd,bsd->bts"}> : () -> ()
    %cst_20 = arith.constant dense<0.000000e+00> : vector<2x8x8xf32>
    %69 = tpu.matmul %66, %67, %cst_20 {dimension_numbers = #tpu.dot_dimension_numbers<[2], [2], [1], [1], [0, 0, 0, 1, 1, 1], [0], [0]>} : vector<2x8x8xf32>, vector<2x8x8xf32>, vector<2x8x8xf32> -> vector<2x8x8xf32>
    %cst_21 = arith.constant 0xFF800000 : f32
    "tpu.trace_stop"() : () -> ()
    %70 = vector.shape_cast %2 : vector<8x8xi1> to vector<1x8x8xi1>
    %71 = vector.broadcast %70 : vector<1x8x8xi1> to vector<2x8x8xi1>
    %72 = vector.broadcast %cst_21 : f32 to vector<2x8x8xf32>
    %73 = arith.select %71, %69, %72 : vector<2x8x8xi1>, vector<2x8x8xf32>
    %cst_22 = arith.constant dense<0xFF800000> : vector<2x8xf32>
    %74 = vector.multi_reduction <maximumf>, %73, %cst_22 [2] : vector<2x8x8xf32> to vector<2x8xf32>
    %75 = vector.shape_cast %74 : vector<2x8xf32> to vector<2x8x1xf32>
    %76 = vector.broadcast %75 : vector<2x8x1xf32> to vector<2x8x8xf32>
    %77 = arith.subf %73, %76 : vector<2x8x8xf32>
    %78 = math.exp %77 : vector<2x8x8xf32>
    %cst_23 = arith.constant dense<0.000000e+00> : vector<2x8xf32>
    %79 = vector.multi_reduction <add>, %78, %cst_23 [2] : vector<2x8x8xf32> to vector<2x8xf32>
    %80 = vector.shape_cast %79 : vector<2x8xf32> to vector<2x8x1xf32>
    %81 = tpu.reciprocal %80 {approx = true} : vector<2x8x1xf32> -> vector<2x8x1xf32>
    %82 = vector.broadcast %81 : vector<2x8x1xf32> to vector<2x8x8xf32>
    %83 = arith.mulf %78, %82 : vector<2x8x8xf32>
    "tpu.trace_start"() <{level = 10 : i32, message = "bts,bsd->btd"}> : () -> ()
    %cst_24 = arith.constant dense<0.000000e+00> : vector<2x8x8xf32>
    %84 = tpu.matmul %83, %68, %cst_24 {dimension_numbers = #tpu.dot_dimension_numbers<[2], [1], [1], [2], [0, 0, 0, 1, 1, 2], [0], [0]>} : vector<2x8x8xf32>, vector<2x8x8xf32>, vector<2x8x8xf32> -> vector<2x8x8xf32>
    "tpu.trace_stop"() : () -> ()
    %85 = vector.shape_cast %84 : vector<2x8x8xf32> to vector<16x8xf32>
    %86 = arith.truncf %85 : vector<16x8xf32> to vector<16x8xbf16>
    %87 = vector.extract_strided_slice %16 {offsets = [16, 0], sizes = [8, 32], strides = [1, 1]} : vector<32x32xbf16> to vector<8x32xbf16>
    %cst_25 = arith.constant dense<0.000000e+00> : vector<16x32xf32>
    %88 = tpu.matmul %86, %87, %cst_25 {dimension_numbers = #tpu.dot_dimension_numbers<[1], [0], [0], [1], [0, 0, 1, 1], [], []>} : vector<16x8xbf16>, vector<8x32xbf16>, vector<16x32xf32> -> vector<16x32xf32>
    %89 = arith.addf %65, %88 : vector<16x32xf32>
    %90 = vector.extract_strided_slice %12 {offsets = [0, 0, 24], sizes = [2, 8, 8], strides = [1, 1, 1]} : vector<2x8x32xf32> to vector<2x8x8xf32>
    %91 = vector.extract_strided_slice %13 {offsets = [0, 0, 24], sizes = [2, 8, 8], strides = [1, 1, 1]} : vector<2x8x32xf32> to vector<2x8x8xf32>
    %92 = vector.extract_strided_slice %14 {offsets = [0, 0, 24], sizes = [2, 8, 8], strides = [1, 1, 1]} : vector<2x8x32xf32> to vector<2x8x8xf32>
    "tpu.trace_start"() <{level = 10 : i32, message = "btd,bsd->bts"}> : () -> ()
    %cst_26 = arith.constant dense<0.000000e+00> : vector<2x8x8xf32>
    %93 = tpu.matmul %90, %91, %cst_26 {dimension_numbers = #tpu.dot_dimension_numbers<[2], [2], [1], [1], [0, 0, 0, 1, 1, 1], [0], [0]>} : vector<2x8x8xf32>, vector<2x8x8xf32>, vector<2x8x8xf32> -> vector<2x8x8xf32>
    %cst_27 = arith.constant 0xFF800000 : f32
    "tpu.trace_stop"() : () -> ()
    %94 = vector.shape_cast %2 : vector<8x8xi1> to vector<1x8x8xi1>
    %95 = vector.broadcast %94 : vector<1x8x8xi1> to vector<2x8x8xi1>
    %96 = vector.broadcast %cst_27 : f32 to vector<2x8x8xf32>
    %97 = arith.select %95, %93, %96 : vector<2x8x8xi1>, vector<2x8x8xf32>
    %cst_28 = arith.constant dense<0xFF800000> : vector<2x8xf32>
    %98 = vector.multi_reduction <maximumf>, %97, %cst_28 [2] : vector<2x8x8xf32> to vector<2x8xf32>
    %99 = vector.shape_cast %98 : vector<2x8xf32> to vector<2x8x1xf32>
    %100 = vector.broadcast %99 : vector<2x8x1xf32> to vector<2x8x8xf32>
    %101 = arith.subf %97, %100 : vector<2x8x8xf32>
    %102 = math.exp %101 : vector<2x8x8xf32>
    %cst_29 = arith.constant dense<0.000000e+00> : vector<2x8xf32>
    %103 = vector.multi_reduction <add>, %102, %cst_29 [2] : vector<2x8x8xf32> to vector<2x8xf32>
    %104 = vector.shape_cast %103 : vector<2x8xf32> to vector<2x8x1xf32>
    %105 = tpu.reciprocal %104 {approx = true} : vector<2x8x1xf32> -> vector<2x8x1xf32>
    %106 = vector.broadcast %105 : vector<2x8x1xf32> to vector<2x8x8xf32>
    %107 = arith.mulf %102, %106 : vector<2x8x8xf32>
    "tpu.trace_start"() <{level = 10 : i32, message = "bts,bsd->btd"}> : () -> ()
    %cst_30 = arith.constant dense<0.000000e+00> : vector<2x8x8xf32>
    %108 = tpu.matmul %107, %92, %cst_30 {dimension_numbers = #tpu.dot_dimension_numbers<[2], [1], [1], [2], [0, 0, 0, 1, 1, 2], [0], [0]>} : vector<2x8x8xf32>, vector<2x8x8xf32>, vector<2x8x8xf32> -> vector<2x8x8xf32>
    "tpu.trace_stop"() : () -> ()
    %109 = vector.shape_cast %108 : vector<2x8x8xf32> to vector<16x8xf32>
    %110 = arith.truncf %109 : vector<16x8xf32> to vector<16x8xbf16>
    %111 = vector.extract_strided_slice %16 {offsets = [24, 0], sizes = [8, 32], strides = [1, 1]} : vector<32x32xbf16> to vector<8x32xbf16>
    %cst_31 = arith.constant dense<0.000000e+00> : vector<16x32xf32>
    %112 = tpu.matmul %110, %111, %cst_31 {dimension_numbers = #tpu.dot_dimension_numbers<[1], [0], [0], [1], [0, 0, 1, 1], [], []>} : vector<16x8xbf16>, vector<8x32xbf16>, vector<16x32xf32> -> vector<16x32xf32>
    %113 = arith.addf %89, %112 : vector<16x32xf32>
    %c0_32 = arith.constant 0 : index
    %c0_33 = arith.constant 0 : index
    %114 = vector.load %arg4[%c0_32, %c0_33] : memref<1x32xf32, #tpu.memory_space<vmem>>, vector<1x32xf32>
    %115 = vector.broadcast %114 : vector<1x32xf32> to vector<16x32xf32>
    %116 = arith.addf %113, %115 : vector<16x32xf32>
    %117 = vector.shape_cast %116 : vector<16x32xf32> to vector<2x8x32xf32>
    %c0_34 = arith.constant 0 : index
    %c0_35 = arith.constant 0 : index
    %c0_36 = arith.constant 0 : index
    %118 = vector.load %arg5[%c0_34, %c0_35, %c0_36] : memref<2x8x32xf32, #tpu.memory_space<vmem>>, vector<2x8x32xf32>
    tpu.vector_store %arg5[%c0_34, %c0_35, %c0_36], %117 {strides = array<i32>} : memref<2x8x32xf32, #tpu.memory_space<vmem>>, vector<2x8x32xf32>,
    return
  }
  func.func @transform_0(%arg0: i32) -> (i32, i32, i32) {
    %c0_i32 = arith.constant 0 : i32
    %c0_i32_0 = arith.constant 0 : i32
    %c0_i32_1 = arith.constant 0 : i32
    return %arg0, %c0_i32, %c0_i32_0 : i32, i32, i32
  }
  func.func @transform_1(%arg0: i32) -> (i32, i32) {
    %c0_i32 = arith.constant 0 : i32
    %c0_i32_0 = arith.constant 0 : i32
    %c0_i32_1 = arith.constant 0 : i32
    return %c0_i32, %c0_i32_0 : i32, i32
  }
  func.func @transform_2(%arg0: i32) -> (i32, i32) {
    %c0_i32 = arith.constant 0 : i32
    %c0_i32_0 = arith.constant 0 : i32
    %c0_i32_1 = arith.constant 0 : i32
    return %c0_i32, %c0_i32_0 : i32, i32
  }
  func.func @transform_3(%arg0: i32) -> (i32, i32) {
    %c0_i32 = arith.constant 0 : i32
    %c0_i32_0 = arith.constant 0 : i32
    %c0_i32_1 = arith.constant 0 : i32
    return %c0_i32, %c0_i32_0 : i32, i32
  }
  func.func @transform_4(%arg0: i32) -> (i32, i32, i32) {
    %c0_i32 = arith.constant 0 : i32
    %c0_i32_0 = arith.constant 0 : i32
    %c0_i32_1 = arith.constant 0 : i32
    return %arg0, %c0_i32, %c0_i32_0 : i32, i32, i32
  }
}

</mosaic_0001>

<bundles_post_ra>
// kernel: tpu_custom_call.1
= control target key start
LH: loop header
LB: loop body
LE: loop exit
PB: predicated region body
PF: predicated region fallthrough
CT: control target
= control target key end

     0   :  { %9 = vsyncpa [#allocation3], 0  ;;  %s2878_s0 = inlined_call_operand.hbm [shape: f32[4,8,32], index: 0, kind: input, shape index: {}]   ;;  %s2879_s1 = inlined_call_operand.hbm [shape: f32[32,96], index: 1, kind: input, shape index: {}]   ;;  %s2880_s2 = inlined_call_operand.hbm [shape: f32[32,32], index: 2, kind: input, shape index: {}]   ;;  %s2881_s3 = inlined_call_operand.vmem [shape: f32[1,32], index: 3, kind: input, shape index: {}]   ;;  %s2882_s4 = inlined_call_operand.hbm [shape: f32[4,8,32], index: 4, kind: output, shape index: {}]  }
   0x1   :  { %11 = vsyncpa [#allocation3 + $0x1], 0 }
   0x2   :  { %12 = vsyncpa [#allocation6], 0 }
   0x3   :  { %13 = vsyncpa [#allocation4], 0 }
   0x4   :  { %15 = vsyncpa [#allocation4 + $0x1], 0  ;;  %s2481_s15 = smov 0   ;;  %s2483_s16 = smov 0  }
   0x5   :  { %s2485_s17 = smov 0   ;;  %s2487_s18 = smov 0  }
   0x6 LB: > { %s2502_s19 = sadd.s32 4294967295, %s2433_s18   ;;  %s1964_s20 = sadd.s32 4294967294, %s2433_s18   ;;  %s2433_s18 = sphi %s2487_s18, %s2905_s18   ;;  %s2429_s17 = sphi %s2485_s17, %s2904_s17   ;;  %s2425_s16 = sphi %s2483_s16, %s2903_s16   ;;  %s2421_s15 = sphi %s2481_s15, %s2902_s15  }
   0x7   : > { %p41_p0 = scmp.ne.s32.totalorder %s2425_s16, %s2421_s15  ;;  %p2883_p1 = scmp.eq.s32.totalorder %s2502_s19, 0 }
   0x8   : > { %p128_p2 = scmp.eq.s32.totalorder %s2502_s19, 1  ;;  %p134_p3 = scmp.eq.s32.totalorder %s1964_s20, 1 }
   0x9   : > { %p2511_p4 = por %p2883_p1, %p41_p0  ;;  %p1965_p5 = scmp.ge.s32.totalorder %s2433_s18, 1 }
   0xa   : > { %p2516_p6 = por %p134_p3, %p41_p0  ;;  %p141_p7 = scmp.lt.s32.totalorder %s2433_s18, 3 }
   0xb   : > { %s2887_s21 = scalar_select %p2511_p4, 1, 0 }
   0xc   : > { %s2888_s22 = scalar_select %p2516_p6, 1, 0 }
   0xd   : > { %p2521_p8 = pnand %p1965_p5, %p141_p7  ;;  %s2435_s24 = smov [#allocation5]  }
   0xe   : > { %s153_s25 = sshll.u32 %s2435_s24, 4  ;;  %s2436_s27 = smov [#allocation7]   ;;  %s154_s25 = int_to_ptr.vmem [resolvable:$true] %s153_s25 }
   0xf   : > { %s2889_s23 = scalar_select %p2521_p8, 1, 0 }
  0x10   : > { %p2181_p9 = pneg %p2521_p8  ;;  %s166_s28 = sshll.u32 %s2436_s27, 4  ;;  %s167_s28 = int_to_ptr.vmem [resolvable:$true] %s166_s28 }
  0x11   : > { %s2296_s29 = scalar_lea.vmem %s154_s25, 512  ;;  %p2304_p5 = scmp.lt.s32.totalorder %s154_s25, %s154_s25 }
  0x12   : > { %p2530_p11 = pnand %p2181_p9, %p2883_p1  ;;  %p2297_p13 = scmp.ne.s32.totalorder %s154_s25, %s2296_s29 }
  0x13   : > { %p2305_p7 = scmp.lt.s32.totalorder %s2296_s29, %s2296_s29 }
  0x14   : > { %p2287_p12 = pneg %p2530_p11 }
  0x15   : > { %p2306_p10 = por %p2305_p7, %p2304_p5 }
  0x16   : > { %p2299_p0 = pnand %p2297_p13, %p2287_p12 }
  0x18   : > { %p2300_p3 = pneg %p2299_p0 }
  0x1a   : > { %p2307_p9 = pnand %p2306_p10, %p2300_p3 }
  0x1c   : > { %2310 = shalt.err (!%p2307_p9)
}
  0x1d   : > { %s2437_s30 = smov 128   ;;  %s2438_s5 = smov 8  }
  0x1e   : > { %2184 = dma.hbm_to_vmem [thread:$0]  (!%p2530_p11), %s2879_s1, 512, %s154_s25, [#allocation6], %s2437_s30, %s2437_s30, %s2438_s5  }
  0x1f   : > { %s2322_s8 = scalar_lea.vmem %s167_s28, 512  ;;  %p2330_p10 = scmp.lt.s32.totalorder %s167_s28, %s167_s28 }
  0x20   : > { %p2323_p13 = scmp.ne.s32.totalorder %s167_s28, %s2322_s8  ;;  %p2331_p3 = scmp.lt.s32.totalorder %s2322_s8, %s2322_s8 }
  0x22   : > { %p2325_p0 = pnand %p2323_p13, %p2287_p12  ;;  %p2332_p7 = por %p2331_p3, %p2330_p10 }
  0x24   : > { %p2326_p5 = pneg %p2325_p0 }
  0x26   : > { %p2333_p9 = pnand %p2332_p7, %p2326_p5 }
  0x28   : > { %2336 = shalt.err (!%p2333_p9)
}
  0x29   : > { %2187 = dma.hbm_to_vmem [thread:$0]  (!%p2530_p11), %s2880_s2, 512, %s167_s28, [#allocation6], %s2437_s30, %s2437_s30, %s2438_s5  }
  0x2a   : > { %s2559_s11 = sadd.s32 1, %s2433_s18   ;;  %s28_s12 = sadd.s32 1, %s2429_s17 }
  0x2b   : > { %s25_s13 = ssub.s32 %s2433_s18, %s2559_s11  ;;  %p35_p12 = scmp.ne.s32.totalorder %s2429_s17, %s2425_s16 }
  0x2c   : > { %p26_p13 = scmp.eq.s32.totalorder %s25_s13, 0  ;;  %p36_p0 = scmp.eq.s32.totalorder %s2433_s18, 0 }
  0x2d   : > { %p2569_p5 = por %p128_p2, %p35_p12  ;;  %p2198_p10 = scmp.lt.s32.totalorder %s2433_s18, 2 }
  0x2e   : > { %s2575_s20 = scalar_select %p26_p13, %s2429_s17, %s28_s12  }
  0x2f   : > { %s2891_s14 = scalar_select %p2569_p5, 1, 0 }
  0x30   : > { %p37_p3 = por %p36_p0, %p35_p12  ;;  %s183_s24 = sand.u32 1, %s2429_s17  }
  0x31   : > { %s1969_s25 = sshll.u32 %s183_s24, 4  ;;  %s2012_s26 = sshll.u32 %s2433_s18, 8 }
  0x32   : > { %s2582_s29 = scalar_lea.hbm %s2878_s0, %s2012_s26  ;;  %s187_s6 = scalar_lea.vmem [#allocation2], %s1969_s25 }
  0x33   : > { %s194_s7 = sshll.u32 %s187_s6, 4  ;;  %p2586_p2 = pnand %p2198_p10, %p37_p3  ;;  %s2584_s7 = int_to_ptr.vmem [resolvable:$true] %s194_s7 }
  0x34   : > { %s2590_s9 = scalar_lea.sflag [#allocation3], %s183_s24  ;;  %s2337_s10 = scalar_lea.hbm %s2582_s29, 256 }
  0x35   : > { %p2338_p11 = scmp.ne.s32.totalorder %s2582_s29, %s2337_s10  ;;  %p2339_p7 = pneg %p2586_p2 }
  0x36   : > { %s2342_s25 = scalar_lea.hbm %s2878_s0, 512  ;;  %p2343_p13 = scmp.lt.s32.totalorder %s2582_s29, %s2878_s0 }
  0x37   : > { %p2340_p9 = pnand %p2339_p7, %p2338_p11  ;;  %p2344_p0 = scmp.lt.s32.totalorder %s2342_s25, %s2337_s10 }
  0x39   : > { %p2341_p12 = pneg %p2340_p9  ;;  %p2345_p10 = por %p2344_p0, %p2343_p13 }
  0x3b   : > { %p2346_p3 = pnand %p2345_p10, %p2341_p12 }
  0x3d   : > { %2349 = shalt.err (!%p2346_p3)
}
  0x3e   : > { %s2350_s24 = scalar_lea.vmem %s2584_s7, 256  ;;  %s2439_s28 = smov [#allocation2]  }
  0x3f   : > { %p2351_p1 = scmp.ne.s32.totalorder %s2584_s7, %s2350_s24  ;;  %s2355_s6 = sshll.u32 %s2439_s28, 4  ;;  %s2356_s6 = int_to_ptr.vmem [resolvable:$false] %s2355_s6 }
  0x40   : > { %s2357_s12 = scalar_lea.vmem %s2356_s6, 512  ;;  %p2358_p9 = scmp.lt.s32.totalorder %s2584_s7, %s2356_s6 }
  0x41   : > { %p2353_p6 = pnand %p2351_p1, %p2339_p7  ;;  %p2359_p5 = scmp.lt.s32.totalorder %s2357_s12, %s2350_s24 }
  0x43   : > { %p2354_p11 = pneg %p2353_p6  ;;  %p2360_p4 = por %p2359_p5, %p2358_p9 }
  0x45   : > { %p2361_p8 = pnand %p2360_p4, %p2354_p11 }
  0x47   : > { %2364 = shalt.err (!%p2361_p8)
}
  0x48   : > { %2191 = dma.hbm_to_vmem [thread:$0]  (!%p2586_p2), %s2582_s29, 256, %s2584_s7, %s2590_s9, %s2437_s30, %s2437_s30, %s2438_s5  }
  0x49   : > { %p2893_p1 = scmp.ne.s32.totalorder %s2889_s23, 0 }
  0x4a   : > { %s2617_s10 = sand.u32 (!%p2893_p1), 1, %s2425_s16   ;;  %p2894_p4 = scmp.ne.s32.totalorder (!%p2893_p1), %s2887_s21, 0 }
  0x4b   : > { %206 = sbr.rel (%p2893_p1) target bundleno = 2867 (0xb33), region = 36  ;;  %s1973_s13 = sshll.u32 (!%p2893_p1), %s2617_s10, 4 }
  0x4c   : > { %s209_s25 = scalar_lea.sflag (!%p2893_p1), [#allocation3], %s2617_s10  ;;  %s212_s8 = scalar_lea.vmem (!%p2893_p1), [#allocation2], %s1973_s13 }
  0x50   : > { %2408 = dma.done.wait (%p2894_p4), %s209_s25, 256  }
  0x51   : > { %2410 = vsyncadd (%p2894_p4), %s209_s25, 4294967040  ;;  %p2895_p6 = scmp.eq.s32.totalorder %s2502_s19, 0 }
  0x53   : > { %2412 = dma.done.wait (%p2895_p6), [#allocation6], 1024   ;;  %p2896_p8 = pmov %p2895_p6 }
  0x54   : > { %v2440_v0 = vmov 0.0   ;;  %vm2441_vm0 = vmmov 0   ;;  %v258_v1 = vld [vmem:[#allocation5 + $0x10] sm:$0xff]  ;;  %v259_v2 = vld [vmem:[#allocation5 + $0x18] sm:$0xff]  ;;  %v256_v3 = vld [vmem:[#allocation5] sm:$0xff]  ;;  %vm262_vm1 = vcmask 261120   ;;  %v248_v18 = vlaneseq }
  0x55   : > { %2414 = vsyncadd (%p2896_p8), [#allocation6], 4294966272  ;;  %2057 = vmatprep.subr.bf16.mxu0 %v2440_v0  ;;  %2061 = vmatprep.mubr.msk.bf16.mxu0 %vm2441_vm0, %v2440_v0  ;;  %v261_v4 = vpack.c.bf16 %v259_v2, %v258_v1  ;;  %v257_v5 = vld [vmem:[#allocation5 + $0x8] sm:$0xff]  ;;  %v253_v7 = vld [vmem:[%s212_s8] sm:$0xff]  ;;  %s2442_s21 = smov 96   ;;  %vm318_vm2 = vcmask 64512  }
  0x56   : > { %2065 = vmatprep.subr.mxu1 %v2440_v0  ;;  %2067 = vmatprep.mubr.msk.f32.mxu1 %vm2441_vm0, %v2440_v0  ;;  %v260_v6 = vpack.c.bf16 %v257_v5, %v256_v3  ;;  %v254_v8 = vld [vmem:[%s212_s8 + $0x8] sm:$0xff]  ;;  %v249_v19 = vshrl.u32 %v248_v18, 7  ;;  %v251_v20 = vand.u32 127, %v248_v18  ;;  %s2443_s23 = smov 64   ;;  %s2444_s30 = smov 88   ;;  %vm989_vm4 = vcmask 1043456  }
  0x57   : > { %2058 = vmatpush3.bf16.msra.mxu0 %v261_v4  ;;  %v255_v9 = vpack.c.bf16 %v254_v8, %v253_v7  ;;  %s2445_s5 = smov 120   ;;  %s2446_s29 = smov 56  }
  0x58   : > { %2059 = vmatprep.subr.bf16.mxu0 %v2440_v0  ;;  %vm2666_vm3 = vcmp.le.s32.totalorder %v251_v20, %v249_v19  ;;  %s2447_s7 = smov 80   ;;  %s2448_s9 = smov 112   ;;  %v309_v20 = vld [vmem:[#allocation7] sm:$0xff] }
  0x59   : > { %s2449_s26 = smov 72   ;;  %s2450_s27 = smov 48  }
  0x5a   : > { %s2451_s24 = smov 104   ;;  %s2452_s28 = smov 40  }
  0x5b   : > { %2060 = vmatpush3.bf16.msra.mxu0 %v260_v6  ;;  %s2013_s25 = sshll.u32 %s2502_s19, 8  ;;  %s244_s8 = scalar_lea.vmem [#allocation8], %s1973_s13 }
  0x5c   : > { %2080 = vmatprep.subr.mxu0 %v2440_v0  ;;  %s1859_s19 = scalar_lea.sflag [#allocation4], %s2617_s10  ;;  %p2899_p2 = scmp.ne.s32.totalorder %s2891_s14, 0 }
  0x5e   : > { %2062 = vmatmul.mubr.msk.bf16.vlgmr.msra.gmra.mxu0 %vm262_vm1, %v255_v9 }
  0x5f   : > { %2082 = vmatprep.mubr.msk.f32.mxu0 %vm2441_vm0, %v2440_v0 }
 0x11e   : > { %v2642_v10 = vpop.f32.mrf.mxu0 }
 0x11f   : > { %316 = vrot.lane.b32.xlu0 %v2642_v10, %s2442_s21  ;;  %v2650_v15 = vmul.f32 0.35355338, %v2642_v10 }
 0x120   : > { %v2063_v11 = vpop.f32.mrf.mxu0 }
 0x122   : > { %v2645_v12 = vpop.f32.mrf.mxu0 }
 0x123   : > { %395 = vrot.lane.b32.xlu0 %v2645_v12, %s2442_s21  ;;  %v2659_v17 = vmul.f32 0.35355338, %v2645_v12  ;;  %s1872_s21 = sshll.u32 %s244_s8, 4  ;;  %s2834_s21 = int_to_ptr.vmem [resolvable:$true] %s1872_s21 }
 0x124   : > { %v2064_v13 = vpop.f32.mrf.mxu0  ;;  %s2365_s13 = scalar_lea.vmem %s2834_s21, 256 }
 0x125   : > { %p2366_p5 = scmp.ne.s32.totalorder %s2834_s21, %s2365_s13 }
 0x127   : > { %p2367_p7 = pnand %p2366_p5, %p2899_p2 }
 0x129   : > { %p2368_p12 = pneg %p2367_p7 }
 0x191   : > { %v317_v14 = vpop.permute.xlu0 %316 }
 0x192   : > { %2066 = vmatpush3.xpose.msk.msra.mxu1 %vm318_vm2, %v317_v14 }
 0x193   : > { %2070 = vmatprep.subr.mxu1 %v2440_v0 }
 0x195   : > { %2068 = vmatmul.mubr.msk.f32.vlgmr.msra.gmra.mxu1 %vm318_vm2, %v2650_v15  ;;  %v396_v16 = vpop.permute.xlu0 %395 }
 0x196   : > { %2071 = vmatpush3.xpose.msk.msra.mxu1 %vm318_vm2, %v396_v16  ;;  %2072 = vmatprep.mubr.msk.f32.mxu1 %vm2441_vm0, %v2440_v0 }
 0x197   : > { %2075 = vmatprep.subr.mxu1 %v2440_v0 }
 0x199   : > { %2073 = vmatmul.mubr.msk.f32.vlgmr.msra.gmra.mxu1 %vm318_vm2, %v2659_v17 }
 0x19a   : > { %2077 = vmatprep.mubr.msk.f32.mxu1 %vm2441_vm0, %v2440_v0 }
 0x255   : > { %v390_v22 = vpop.f32.mrf.mxu1 }
 0x256   : > { %v474_v23 = vsel %vm2666_vm3, %v390_v22, -inf  ;;  %v310_v22 = vld [vmem:[#allocation7 + $0x8] sm:$0xff] }
 0x257   : > { %v2069_v24 = vpop.f32.mrf.mxu1  ;;  %v476_v25 = vsel %vm318_vm2, %v474_v23, -inf }
 0x258   : > { %477 = vmax.xlane.f32.xlu1 %v476_v25  ;;  %v313_v25 = vpack.c.bf16 %v310_v22, %v309_v20 }
 0x259   : > { %v468_v26 = vpop.f32.mrf.mxu1 }
 0x25a   : > { %v475_v27 = vsel %vm2666_vm3, %v468_v26, -inf }
 0x25b   : > { %v2074_v28 = vpop.f32.mrf.mxu1  ;;  %v479_v29 = vsel %vm318_vm2, %v475_v27, -inf }
 0x25c   : > { %480 = vmax.xlane.f32.xlu1 %v479_v29  ;;  %v1038_v28 = vsel %vm989_vm4, %v313_v25, 0 }
 0x26d   : > { %498 = vrot.lane.b32.xlu1 %v2642_v10, %s2443_s23 }
 0x271   : > { %574 = vrot.lane.b32.xlu1 %v2645_v12, %s2443_s23 }
 0x275   : > { %653 = vrot.lane.b32.xlu1 %v2642_v10, %s2444_s30 }
 0x279   : > { %731 = vrot.lane.b32.xlu1 %v2645_v12, %s2444_s30 }
 0x2e1   : > { %v478_v30 = vpop.xlane.xlu1 %477 }
 0x2e2   : > { %v482_v31 = vsub.f32 %v474_v23, %v478_v30 }
 0x2e4   : > { %v484_v32 = vmul.f32 1.442695, %v482_v31  ;;  %v985_v31 = vrot.slane %v313_v25, 4 }
 0x2e5   : > { %v481_v33 = vpop.xlane.xlu1 %480 }
 0x2e6   : > { %2253 = vpow2.f32 %v484_v32  ;;  %v483_v34 = vsub.f32 %v475_v27, %v481_v33  ;;  %v991_v32 = vsel %vm989_vm4, %v985_v31, 0 }
 0x2e8   : > { %v486_v35 = vmul.f32 1.442695, %v483_v34 }
 0x2e9   : > { %v499_v36 = vpop.permute.xlu1 %498 }
 0x2ea   : > { %2255 = vpow2.f32 %v486_v35  ;;  %2076 = vmatpush3.msra.mxu1 %v499_v36 }
 0x2eb   : > { %2085 = vmatprep.subr.mxu1 %v2440_v0 }
 0x2ed   : > { %v575_v37 = vpop.permute.xlu1 %574 }
 0x2ee   : > { %2081 = vmatpush3.msra.mxu0 %v575_v37 }
 0x2ef   : > { %2090 = vmatprep.subr.mxu0 %v2440_v0 }
 0x2f1   : > { %v654_v42 = vpop.permute.xlu1 %653 }
 0x2f3   : > { %v2254_v38 = vpop.eup %2253 }
 0x2f4   : > { %v488_v39 = vsel %vm318_vm2, %v2254_v38, 0.0 }
 0x2f5   : > { %489 = vadd.xlane.f32.xlu0 %v488_v39  ;;  %v732_v43 = vpop.permute.xlu1 %731 }
 0x2f7   : > { %v2256_v40 = vpop.eup %2255 }
 0x2f8   : > { %v491_v41 = vsel %vm318_vm2, %v2256_v40, 0.0 }
 0x2f9   : > { %492 = vadd.xlane.f32.xlu1 %v491_v41 }
 0x30a   : > { %729 = vrot.lane.b32.xlu1 %v2659_v17, %s2445_s5 }
 0x30b   : > { %651 = vrot.lane.b32.xlu0 %v2650_v15, %s2445_s5  ;;  %s2832_s5 = scalar_lea.hbm %s2882_s4, %s2013_s25 }
 0x37e   : > { %v490_v44 = vpop.xlane.xlu0 %489 }
 0x37f   : > { %2257 = vrcp.f32 %v490_v44 }
 0x382   : > { %v493_v45 = vpop.xlane.xlu1 %492  ;;  %v652_v50 = vpop.permute.xlu0 %651 }
 0x383   : > { %2259 = vrcp.f32 %v493_v45 }
 0x386   : > { %v730_v51 = vpop.permute.xlu1 %729 }
 0x38c   : > { %v2258_v46 = vpop.eup %2257 }
 0x38d   : > { %v496_v47 = vmul.f32 %v2258_v46, %v2254_v38 }
 0x38f   : > { %2078 = vmatmul.mubr.msk.f32.vlgmr.msra.gmra.mxu1 %vm318_vm2, %v496_v47 }
 0x390   : > { %v2260_v48 = vpop.eup %2259  ;;  %2086 = vmatpush3.xpose.msk.msra.mxu1 %vm318_vm2, %v654_v42  ;;  %2087 = vmatprep.mubr.msk.f32.mxu1 %vm2441_vm0, %v2440_v0 }
 0x391   : > { %v497_v49 = vmul.f32 %v2260_v48, %v2256_v40  ;;  %2095 = vmatprep.subr.mxu1 %v2440_v0 }
 0x393   : > { %2083 = vmatmul.mubr.msk.f32.vlgmr.msra.gmra.mxu0 %vm318_vm2, %v497_v49  ;;  %2088 = vmatmul.mubr.msk.f32.vlgmr.msra.gmra.mxu1 %vm318_vm2, %v652_v50 }
 0x394   : > { %2091 = vmatpush3.xpose.msk.msra.mxu0 %vm318_vm2, %v732_v43  ;;  %2092 = vmatprep.mubr.msk.f32.mxu0 %vm2441_vm0, %v2440_v0 }
 0x395   : > { %2100 = vmatprep.subr.mxu0 %v2440_v0  ;;  %2097 = vmatprep.mubr.msk.f32.mxu1 %vm2441_vm0, %v2440_v0 }
 0x397   : > { %2093 = vmatmul.mubr.msk.f32.vlgmr.msra.gmra.mxu0 %vm318_vm2, %v730_v51 }
 0x398   : > { %2102 = vmatprep.mubr.msk.f32.mxu0 %vm2441_vm0, %v2440_v0 }
 0x44f   : > { %v2702_v52 = vpop.f32.mrf.mxu1 }
 0x451   : > { %v2079_v53 = vpop.f32.mrf.mxu1 }
 0x453   : > { %v2704_v54 = vpop.f32.mrf.mxu0  ;;  %v725_v55 = vpop.f32.mrf.mxu1 }
 0x454   : > { %v650_v56 = vpack.c.bf16 %v2704_v54, %v2702_v52  ;;  %v807_v57 = vsel %vm2666_vm3, %v725_v55, -inf }
 0x455   : > { %v2084_v58 = vpop.f32.mrf.mxu0  ;;  %v2089_v59 = vpop.f32.mrf.mxu1  ;;  %v809_v60 = vsel %vm318_vm2, %v807_v57, -inf }
 0x456   : > { %810 = vmax.xlane.f32.xlu1 %v809_v60 }
 0x457   : > { %v803_v61 = vpop.f32.mrf.mxu0 }
 0x458   : > { %v808_v62 = vsel %vm2666_vm3, %v803_v61, -inf }
 0x459   : > { %v2094_v63 = vpop.f32.mrf.mxu0  ;;  %v812_v1 = vsel %vm318_vm2, %v808_v62, -inf }
 0x45a   : > { %813 = vmax.xlane.f32.xlu0 %v812_v1 }
 0x470   : > { %907 = vrot.lane.b32.xlu0 %v2645_v12, %s2446_s29 }
 0x474   : > { %1083 = vrot.lane.b32.xlu0 %v2642_v10, %s2447_s7 }
 0x4df   : > { %v811_v2 = vpop.xlane.xlu1 %810 }
 0x4e0   : > { %v815_v3 = vsub.f32 %v807_v57, %v811_v2 }
 0x4e2   : > { %v817_v4 = vmul.f32 1.442695, %v815_v3 }
 0x4e3   : > { %v814_v5 = vpop.xlane.xlu0 %813 }
 0x4e4   : > { %2261 = vpow2.f32 %v817_v4  ;;  %v816_v6 = vsub.f32 %v808_v62, %v814_v5 }
 0x4e6   : > { %v819_v7 = vmul.f32 1.442695, %v816_v6 }
 0x4e7   : > { %v908_v8 = vpop.permute.xlu0 %907 }
 0x4e8   : > { %2263 = vpow2.f32 %v819_v7  ;;  %2101 = vmatpush3.msra.mxu0 %v908_v8 }
 0x4e9   : > { %2111 = vmatprep.subr.bf16.mxu0 %v2440_v0 }
 0x4eb   : > { %v1084_v38 = vpop.permute.xlu0 %1083 }
 0x4f1   : > { %v2262_v9 = vpop.eup %2261 }
 0x4f2   : > { %v821_v11 = vsel %vm318_vm2, %v2262_v9, 0.0 }
 0x4f3   : > { %822 = vadd.xlane.f32.xlu1 %v821_v11 }
 0x4f5   : > { %v2264_v13 = vpop.eup %2263 }
 0x4f6   : > { %v824_v14 = vsel %vm318_vm2, %v2264_v13, 0.0 }
 0x4f7   : > { %825 = vadd.xlane.f32.xlu1 %v824_v14 }
 0x508   : > { %831 = vrot.lane.b32.xlu1 %v2642_v10, %s2446_s29  ;;  %s2453_s29 = smov [#allocation8]  }
 0x50c   : > { %1161 = vrot.lane.b32.xlu1 %v2645_v12, %s2447_s7  ;;  %s2369_s7 = sshll.u32 %s2453_s29, 4  ;;  %s2370_s7 = int_to_ptr.vmem [resolvable:$false] %s2369_s7 }
 0x50d   : > { %p2372_p13 = scmp.lt.s32.totalorder %s2834_s21, %s2370_s7 }
 0x510   : > { %1159 = vrot.lane.b32.xlu1 %v2659_v17, %s2448_s9 }
 0x514   : > { %1081 = vrot.lane.b32.xlu1 %v2650_v15, %s2448_s9  ;;  %s2371_s9 = scalar_lea.vmem %s2370_s7, 512 }
 0x515   : > { %p2373_p0 = scmp.lt.s32.totalorder %s2371_s9, %s2365_s13 }
 0x517   : > { %p2374_p10 = por %p2373_p0, %p2372_p13 }
 0x518   : > { %1465 = vrot.lane.b32.xlu1 %v2642_v10, %s2449_s26 }
 0x519   : > { %p2375_p3 = pnand %p2374_p10, %p2368_p12 }
 0x57c   : > { %v823_v16 = vpop.xlane.xlu1 %822 }
 0x57d   : > { %2265 = vrcp.f32 %v823_v16 }
 0x580   : > { %v826_v18 = vpop.xlane.xlu1 %825 }
 0x581   : > { %2267 = vrcp.f32 %v826_v18 }
 0x584   : > { %v832_v19 = vpop.permute.xlu1 %831 }
 0x585   : > { %2096 = vmatpush3.msra.mxu1 %v832_v19 }
 0x586   : > { %2105 = vmatprep.subr.bf16.mxu1 %v2440_v0 }
 0x588   : > { %v1162_v29 = vpop.permute.xlu1 %1161 }
 0x58a   : > { %v2266_v23 = vpop.eup %2265 }
 0x58b   : > { %v829_v24 = vmul.f32 %v2266_v23, %v2262_v9 }
 0x58c   : > { %v1160_v30 = vpop.permute.xlu1 %1159 }
 0x58d   : > { %2098 = vmatmul.mubr.msk.f32.vlgmr.msra.gmra.mxu1 %vm318_vm2, %v829_v24 }
 0x58e   : > { %v2268_v26 = vpop.eup %2267  ;;  %2107 = vmatprep.mubr.msk.bf16.mxu1 %vm2441_vm0, %v2440_v0  ;;  %2106 = vmatpush3.bf16.msra.mxu1 %v991_v32 }
 0x58f   : > { %v830_v27 = vmul.f32 %v2268_v26, %v2264_v13  ;;  %2117 = vmatprep.subr.mxu1 %v2440_v0 }
 0x590   : > { %v1082_v42 = vpop.permute.xlu1 %1081 }
 0x591   : > { %2103 = vmatmul.mubr.msk.f32.vlgmr.msra.gmra.mxu0 %vm318_vm2, %v830_v27 }
 0x592   : > { %2112 = vmatpush3.bf16.msra.mxu0 %v1038_v28  ;;  %2113 = vmatprep.mubr.msk.bf16.mxu0 %vm2441_vm0, %v2440_v0  ;;  %v311_v28 = vld [vmem:[#allocation7 + $0x10] sm:$0xff] }
 0x593   : > { %2122 = vmatprep.subr.mxu0 %v2440_v0 }
 0x594   : > { %v1466_v60 = vpop.permute.xlu1 %1465 }
 0x595   : > { %2114 = vmatmul.mubr.msk.bf16.vlgmr.msra.gmra.mxu0 %vm318_vm2, %v650_v56 }
 0x596   : > { %2123 = vmatpush3.xpose.msk.msra.mxu0 %vm318_vm2, %v1162_v29  ;;  %2124 = vmatprep.mubr.msk.f32.mxu0 %vm2441_vm0, %v2440_v0  ;;  %v312_v29 = vld [vmem:[#allocation7 + $0x18] sm:$0xff] }
 0x597   : > { %2132 = vmatprep.subr.mxu0 %v2440_v0 }
 0x59d   : > { %2125 = vmatmul.mubr.msk.f32.vlgmr.msra.gmra.mxu0 %vm318_vm2, %v1160_v30  ;;  %v314_v30 = vpack.c.bf16 %v312_v29, %v311_v28 }
 0x59e   : > { %2134 = vmatprep.mubr.msk.f32.mxu0 %vm2441_vm0, %v2440_v0 }
 0x59f   : > { %v1418_v31 = vsel %vm989_vm4, %v314_v30, 0 }
 0x64d   : > { %v903_v33 = vpop.f32.mrf.mxu1 }
 0x64f   : > { %v2099_v34 = vpop.f32.mrf.mxu1 }
 0x651   : > { %v979_v35 = vpop.f32.mrf.mxu0 }
 0x652   : > { %v983_v36 = vpack.c.bf16 %v979_v35, %v903_v33 }
 0x653   : > { %v2104_v37 = vpop.f32.mrf.mxu0 }
 0x654   : > { %2108 = vmatmul.mubr.msk.bf16.vlgmr.msra.gmra.mxu1 %vm318_vm2, %v983_v36 }
 0x655   : > { %2118 = vmatpush3.xpose.msk.msra.mxu1 %vm318_vm2, %v1084_v38  ;;  %v2746_v39 = vpop.f32.mrf.mxu0  ;;  %2119 = vmatprep.mubr.msk.f32.mxu1 %vm2441_vm0, %v2440_v0 }
 0x656   : > { %2127 = vmatprep.subr.mxu1 %v2440_v0 }
 0x657   : > { %v2115_v40 = vpop.f32.mrf.mxu0 }
 0x659   : > { %v2751_v41 = vpop.f32.mrf.mxu0 }
 0x65b   : > { %v2116_v43 = vpop.f32.mrf.mxu0 }
 0x65c   : > { %2120 = vmatmul.mubr.msk.f32.vlgmr.msra.gmra.mxu1 %vm318_vm2, %v1082_v42 }
 0x65d   : > { %v1233_v44 = vpop.f32.mrf.mxu0  ;;  %2129 = vmatprep.mubr.msk.f32.mxu1 %vm2441_vm0, %v2440_v0 }
 0x65e   : > { %v1238_v45 = vsel %vm2666_vm3, %v1233_v44, -inf }
 0x65f   : > { %v2126_v46 = vpop.f32.mrf.mxu0  ;;  %v1242_v47 = vsel %vm318_vm2, %v1238_v45, -inf }
 0x660   : > { %1243 = vmax.xlane.f32.xlu0 %v1242_v47 }
 0x676   : > { %1337 = vrot.lane.b32.xlu0 %v2645_v12, %s2450_s27 }
 0x67a   : > { %1463 = vrot.lane.b32.xlu0 %v2650_v15, %s2451_s24 }
 0x67e   : > { %1541 = vrot.lane.b32.xlu0 %v2659_v17, %s2451_s24 }
 0x6e9   : > { %v1244_v48 = vpop.xlane.xlu0 %1243 }
 0x6ea   : > { %v1246_v49 = vsub.f32 %v1238_v45, %v1244_v48 }
 0x6ec   : > { %v1249_v50 = vmul.f32 1.442695, %v1246_v49 }
 0x6ed   : > { %v1338_v51 = vpop.permute.xlu0 %1337 }
 0x6ee   : > { %2269 = vpow2.f32 %v1249_v50  ;;  %2133 = vmatpush3.msra.mxu0 %v1338_v51 }
 0x6ef   : > { %2143 = vmatprep.subr.mxu0 %v2440_v0 }
 0x6f1   : > { %v1464_v1 = vpop.permute.xlu0 %1463 }
 0x6f5   : > { %v1542_v3 = vpop.permute.xlu0 %1541 }
 0x6fb   : > { %v2270_v52 = vpop.eup %2269 }
 0x6fc   : > { %v1254_v53 = vsel %vm318_vm2, %v2270_v52, 0.0 }
 0x6fd   : > { %1255 = vadd.xlane.f32.xlu1 %v1254_v53 }
 0x70e   : > { %1543 = vrot.lane.b32.xlu1 %v2645_v12, %s2449_s26 }
 0x714   : > { %v2767_v54 = vpop.f32.mrf.mxu1 }
 0x716   : > { %v2109_v15 = vpop.f32.mrf.mxu1 }
 0x717   : > { %v1075_v15 = vadd.f32 %v2746_v39, %v2767_v54  ;;  %v2006_v39 = vld [vmem:[%s2881_s3] ss:$0 sm:$0xff] }
 0x718   : > { %v2769_v55 = vpop.f32.mrf.mxu1 }
 0x71a   : > { %v2110_v17 = vpop.f32.mrf.mxu1 }
 0x71c   : > { %v1155_v56 = vpop.f32.mrf.mxu1 }
 0x71d   : > { %v1237_v58 = vsel %vm2666_vm3, %v1155_v56, -inf }
 0x71e   : > { %v2121_v57 = vpop.f32.mrf.mxu1  ;;  %v1239_v59 = vsel %vm318_vm2, %v1237_v58, -inf }
 0x732   : > { %1240 = vmax.xlane.f32.xlu1 %v1239_v59 }
 0x786   : > { %v1256_v61 = vpop.xlane.xlu1 %1255 }
 0x787   : > { %2271 = vrcp.f32 %v1256_v61 }
 0x78a   : > { %v1544_v2 = vpop.permute.xlu1 %1543 }
 0x794   : > { %v2272_v62 = vpop.eup %2271 }
 0x795   : > { %v1260_v63 = vmul.f32 %v2272_v62, %v2270_v52  ;;  %v1797_v52 = vrot.slane %v314_v30, 4 }
 0x797   : > { %2135 = vmatmul.mubr.msk.f32.vlgmr.msra.gmra.mxu0 %vm318_vm2, %v1260_v63  ;;  %v1802_v53 = vsel %vm989_vm4, %v1797_v52, 0 }
 0x798   : > { %2144 = vmatpush3.xpose.msk.msra.mxu0 %vm318_vm2, %v1466_v60  ;;  %2145 = vmatprep.mubr.msk.f32.mxu0 %vm2441_vm0, %v2440_v0 }
 0x799   : > { %2148 = vmatprep.subr.mxu0 %v2440_v0 }
 0x79b   : > { %2146 = vmatmul.mubr.msk.f32.vlgmr.msra.gmra.mxu0 %vm318_vm2, %v1464_v1 }
 0x79c   : > { %2149 = vmatpush3.xpose.msk.msra.mxu0 %vm318_vm2, %v1544_v2  ;;  %2150 = vmatprep.mubr.msk.f32.mxu0 %vm2441_vm0, %v2440_v0 }
 0x79d   : > { %2158 = vmatprep.subr.mxu0 %v2440_v0 }
 0x79f   : > { %2151 = vmatmul.mubr.msk.f32.vlgmr.msra.gmra.mxu0 %vm318_vm2, %v1542_v3 }
 0x7a0   : > { %2160 = vmatprep.mubr.msk.f32.mxu0 %vm2441_vm0, %v2440_v0 }
 0x7bb   : > { %v1241_v4 = vpop.xlane.xlu1 %1240 }
 0x7bc   : > { %v1245_v5 = vsub.f32 %v1237_v58, %v1241_v4  ;;  %v1078_v58 = vadd.f32 %v2751_v41, %v2769_v55 }
 0x7be   : > { %v1247_v6 = vmul.f32 1.442695, %v1245_v5 }
 0x7c0   : > { %2273 = vpow2.f32 %v1247_v6 }
 0x7cd   : > { %v2274_v7 = vpop.eup %2273 }
 0x7ce   : > { %v1251_v8 = vsel %vm318_vm2, %v2274_v7, 0.0 }
 0x7cf   : > { %1252 = vadd.xlane.f32.xlu0 %v1251_v8 }
 0x7e5   : > { %1261 = vrot.lane.b32.xlu0 %v2642_v10, %s2450_s27 }
 0x7e9   : > { %1719 = vrot.lane.b32.xlu0 %v2645_v12, %s2452_s28 }
 0x857   : > { %v1409_v9 = vpop.f32.mrf.mxu0 }
 0x858   : > { %v1253_v11 = vpop.xlane.xlu0 %1252 }
 0x859   : > { %2275 = vrcp.f32 %v1253_v11  ;;  %v2136_v13 = vpop.f32.mrf.mxu0 }
 0x85b   : > { %v1537_v14 = vpop.f32.mrf.mxu0 }
 0x85c   : > { %v1619_v16 = vsel %vm2666_vm3, %v1537_v14, -inf  ;;  %v1262_v18 = vpop.permute.xlu0 %1261 }
 0x85d   : > { %2128 = vmatpush3.msra.mxu1 %v1262_v18  ;;  %v2147_v19 = vpop.f32.mrf.mxu0  ;;  %v1621_v20 = vsel %vm318_vm2, %v1619_v16, -inf }
 0x85e   : > { %1622 = vmax.xlane.f32.xlu1 %v1621_v20  ;;  %2137 = vmatprep.subr.bf16.mxu1 %v2440_v0 }
 0x85f   : > { %v1615_v22 = vpop.f32.mrf.mxu0 }
 0x860   : > { %v1620_v12 = vsel %vm2666_vm3, %v1615_v22, -inf  ;;  %v1720_v23 = vpop.permute.xlu0 %1719 }
 0x861   : > { %v2152_v24 = vpop.f32.mrf.mxu0  ;;  %2159 = vmatpush3.msra.mxu0 %v1720_v23  ;;  %v1624_v25 = vsel %vm318_vm2, %v1620_v12, -inf }
 0x862   : > { %1625 = vmax.xlane.f32.xlu1 %v1624_v25 }
 0x866   : > { %v2276_v26 = vpop.eup %2275 }
 0x867   : > { %v1259_v27 = vmul.f32 %v2276_v26, %v2274_v7 }
 0x869   : > { %2130 = vmatmul.mubr.msk.f32.vlgmr.msra.gmra.mxu1 %vm318_vm2, %v1259_v27 }
 0x86a   : > { %2139 = vmatprep.mubr.msk.bf16.mxu1 %vm2441_vm0, %v2440_v0  ;;  %2138 = vmatpush3.bf16.msra.mxu1 %v1418_v31 }
 0x86b   : > { %2153 = vmatprep.subr.mxu1 %v2440_v0 }
 0x8e7   : > { %v1623_v21 = vpop.xlane.xlu1 %1622 }
 0x8e8   : > { %v1627_v32 = vsub.f32 %v1619_v16, %v1623_v21 }
 0x8ea   : > { %v1629_v33 = vmul.f32 1.442695, %v1627_v32 }
 0x8eb   : > { %v1626_v34 = vpop.xlane.xlu1 %1625 }
 0x8ec   : > { %2277 = vpow2.f32 %v1629_v33  ;;  %v1628_v35 = vsub.f32 %v1620_v12, %v1626_v34 }
 0x8ee   : > { %v1631_v36 = vmul.f32 1.442695, %v1628_v35 }
 0x8f0   : > { %2279 = vpow2.f32 %v1631_v36 }
 0x8f9   : > { %v2278_v37 = vpop.eup %2277 }
 0x8fa   : > { %v1633_v38 = vsel %vm318_vm2, %v2278_v37, 0.0 }
 0x8fb   : > { %1634 = vadd.xlane.f32.xlu1 %v1633_v38 }
 0x8fd   : > { %v2280_v40 = vpop.eup %2279 }
 0x8fe   : > { %v1636_v42 = vsel %vm318_vm2, %v2280_v40, 0.0 }
 0x8ff   : > { %1637 = vadd.xlane.f32.xlu1 %v1636_v42 }
 0x910   : > { %1643 = vrot.lane.b32.xlu1 %v2642_v10, %s2452_s28 }
 0x929   : > { %v1333_v43 = vpop.f32.mrf.mxu1 }
 0x92a   : > { %v1413_v44 = vpack.c.bf16 %v1409_v9, %v1333_v43 }
 0x92b   : > { %v2131_v45 = vpop.f32.mrf.mxu1 }
 0x92c   : > { %2140 = vmatmul.mubr.msk.bf16.vlgmr.msra.gmra.mxu1 %vm318_vm2, %v1413_v44 }
 0x92d   : > { %2155 = vmatprep.mubr.msk.f32.mxu1 %vm2441_vm0, %v2440_v0 }
 0x984   : > { %v1635_v46 = vpop.xlane.xlu1 %1634 }
 0x985   : > { %2281 = vrcp.f32 %v1635_v46 }
 0x988   : > { %v1638_v47 = vpop.xlane.xlu1 %1637 }
 0x989   : > { %2283 = vrcp.f32 %v1638_v47 }
 0x98c   : > { %v1644_v48 = vpop.permute.xlu1 %1643 }
 0x98d   : > { %2154 = vmatpush3.msra.mxu1 %v1644_v48 }
 0x98e   : > { %2163 = vmatprep.subr.bf16.mxu1 %v2440_v0 }
 0x992   : > { %v2282_v49 = vpop.eup %2281 }
 0x993   : > { %v1641_v50 = vmul.f32 %v2282_v49, %v2278_v37 }
 0x995   : > { %2156 = vmatmul.mubr.msk.f32.vlgmr.msra.gmra.mxu1 %vm318_vm2, %v1641_v50 }
 0x996   : > { %v2284_v10 = vpop.eup %2283  ;;  %2165 = vmatprep.mubr.msk.bf16.mxu1 %vm2441_vm0, %v2440_v0  ;;  %2164 = vmatpush3.bf16.msra.mxu1 %v1802_v53 }
 0x997   : > { %v1642_v51 = vmul.f32 %v2284_v10, %v2280_v40 }
 0x999   : > { %2161 = vmatmul.mubr.msk.f32.vlgmr.msra.gmra.mxu0 %vm318_vm2, %v1642_v51 }
 0x9ec   : > { %v1454_v17 = vpop.f32.mrf.mxu1 }
 0x9ed   : > { %v1461_v56 = vadd.f32 %v1454_v17, %v1075_v15 }
 0x9ee   : > { %v2141_v57 = vpop.f32.mrf.mxu1 }
 0x9f0   : > { %v1457_v59 = vpop.f32.mrf.mxu1 }
 0x9f1   : > { %v1462_v0 = vadd.f32 %v1457_v59, %v1078_v58 }
 0x9f2   : > { %v2142_v60 = vpop.f32.mrf.mxu1 }
 0xa55   : > { %v1715_v61 = vpop.f32.mrf.mxu1 }
 0xa57   : > { %v2157_v62 = vpop.f32.mrf.mxu1 }
 0xa59   : > { %v1791_v63 = vpop.f32.mrf.mxu0 }
 0xa5a   : > { %v1795_v1 = vpack.c.bf16 %v1791_v63, %v1715_v61 }
 0xa5b   : > { %v2162_v2 = vpop.f32.mrf.mxu0 }
 0xa5c   : > { %2166 = vmatmul.mubr.msk.bf16.vlgmr.msra.gmra.mxu1 %vm318_vm2, %v1795_v1 }
 0xb1c   : > { %v1838_v3 = vpop.f32.mrf.mxu1 }
 0xb1d   : > { %v1845_v54 = vadd.f32 %v1838_v3, %v1461_v56 }
 0xb1e   : > { %v2167_v4 = vpop.f32.mrf.mxu1 }
 0xb1f   : > { %v1854_v41 = vadd.f32 %v2006_v39, %v1845_v54 }
 0xb20   : > { %v1841_v55 = vpop.f32.mrf.mxu1 }
 0xb21   : > { %1856 = vst.msk [vmem:[%s244_s8] sm:$0xff] %vm262_vm1, %v1854_v41  ;;  %v1846_v5 = vadd.f32 %v1841_v55, %v1462_v0 }
 0xb22   : > { %v2168_v6 = vpop.f32.mrf.mxu1 }
 0xb23   : > { %v1855_v7 = vadd.f32 %v2006_v39, %v1846_v5 }
 0xb25   : > { %1857 = vst.msk [vmem:[%s244_s8 + $0x8] sm:$0xff] %vm262_vm1, %v1855_v7 }
 0xb26   : > { %2378 = shalt.err (!%p2375_p3)
}
 0xb27   : > { %s2379_s26 = scalar_lea.hbm %s2832_s5, 256  ;;  %s2383_s28 = scalar_lea.hbm %s2882_s4, 512 }
 0xb28   : > { %p2380_p11 = scmp.ne.s32.totalorder %s2832_s5, %s2379_s26  ;;  %p2384_p4 = scmp.lt.s32.totalorder %s2832_s5, %s2882_s4 }
 0xb29   : > { %p2385_p6 = scmp.lt.s32.totalorder %s2383_s28, %s2379_s26 }
 0xb2a   : > { %p2381_p9 = pnand %p2380_p11, %p2899_p2 }
 0xb2b   : > { %p2386_p8 = por %p2385_p6, %p2384_p4 }
 0xb2c   : > { %p2382_p1 = pneg %p2381_p9 }
 0xb2e   : > { %p2387_p5 = pnand %p2386_p8, %p2382_p1 }
 0xb30   : > { %2390 = shalt.err (!%p2387_p5)
}
 0xb31   : > { %s2454_s25 = smov 128   ;;  %s2455_s8 = smov 8  }
 0xb32   : > { %2179 = dma.vmem_to_hbm [thread:$0]  (%p2899_p2), %s2834_s21, 256, %s2832_s5, %s1859_s19, %s2454_s25, %s2454_s25, %s2455_s8  }
 0xb33 PF: > { %s1887_s23 = sand.u32 1, %s2421_s15   ;;  %p2900_p7 = scmp.ne.s32.totalorder %s2888_s22, 0 }
 0xb34   : > { %p2901_p12 = scmp.ge.s32.totalorder %s2433_s18, 2  ;;  %s1888_s30 = scalar_lea.sflag [#allocation4], %s1887_s23 }
 0xb36   : > { %p2193_p13 = pnand %p2901_p12, %p2900_p7 }
 0xb38   : > { %p2194_p0 = pneg %p2193_p13 }
 0xb3a   : > { %2416 = dma.done.wait (%p2194_p0), %s1888_s30, 256  }
 0xb3b   : > { %2418 = vsyncadd (%p2194_p0), %s1888_s30, 4294967040  ;;  %p18_p10 = scmp.ge.s32.totalorder %s2559_s11, 4   ;;  %s2902_s15 = smov %s2425_s16 }
 0xb3c   : > { %s2903_s16 = smov %s2429_s17  ;;  %s2904_s17 = smov %s2575_s20 }
 0xb3d   : > { %s2905_s18 = smov %s2559_s11  ;;  %20 = sbr.rel (!%p18_p10) target bundleno = 6 (0x6), region = 89 }
 0xb42   :  { %1893 = vsyncpa [#allocation3], 1 }
 0xb43   :  { %1895 = vsyncpa [#allocation3 + $0x1], 1 }
 0xb44   :  { %1896 = vsyncpa [#allocation6], 1 }
 0xb45   :  { %1897 = vsyncpa [#allocation4], 1 }
 0xb46   :  { %1899 = vsyncpa [#allocation4 + $0x1], 1 }

</bundles_post_ra>
